<compile_context>
chip_gen: v7x
topology: tpu7x:2x2x1
jax: 0.10.0
libtpu: 0.0.40
codegen_flags: <defaults>
</compile_context>

<pallas_src>
import functools
import math

import jax
import jax.numpy as jnp
from jax import lax
from jax.experimental import pallas as pl
from jax.experimental.pallas import tpu as pltpu


def _round_up(x, m):
    return ((x + m - 1) // m) * m


# ---------------------------------------------------------------------------
# In-kernel activation helper
# ---------------------------------------------------------------------------
def _apply_activation(y, activation, a_ref):
    if activation == "prelu":
        a = a_ref[...]                        # (Cout, 1): scalar or per-channel alpha
        return jnp.where(y >= 0.0, y, a * y)
    if activation == "leakyrelu":
        return jnp.where(y >= 0.0, y, 0.2 * y)
    if activation == "tanh":
        return jnp.tanh(y)
    return y


# ---------------------------------------------------------------------------
# Kernel A: fused conv (lane-dense im2col matmul) + per-channel affine + activation
#   y = (W @ P) * scale + shift ; out = act(y)
#     - no-BN path:    scale = 1,                     shift = bias
#     - BN path (p2):  scale = gamma*rsqrt(var+eps),  shift = beta - mean0*scale
# ---------------------------------------------------------------------------
def _make_conv_affine_act_kernel(activation):
    def kernel(*refs):
        i = 0
        p_ref = refs[i]; i += 1                 # (Kpad, TM)   bf16 patch tile
        w_ref = refs[i]; i += 1                 # (Cout, Kpad) bf16 weights  (resident)
        sc_ref = refs[i]; i += 1                # (Cout, 1)    f32 scale     (resident)
        sh_ref = refs[i]; i += 1                # (Cout, 1)    f32 shift     (resident)
        a_ref = None
        if activation == "prelu":
            a_ref = refs[i]; i += 1             # (Cout, 1)    f32 PReLU alpha
        o_ref = refs[i]                         # (Cout, TM)   f32 output

        y = jnp.dot(w_ref[...], p_ref[...], preferred_element_type=jnp.float32)
        y = y * sc_ref[...] + sh_ref[...]
        o_ref[...] = _apply_activation(y, activation, a_ref)

    return kernel


# ---------------------------------------------------------------------------
# Kernel B (BN path, pass 1): per-channel sum / sum-of-squares of the bias-free
# conv output, accumulated in the VMEM-resident (Cout, 2) output block across the
# whole grid.  K / HW zero-padding contributes exact zeros -> no masking needed.
# ---------------------------------------------------------------------------
def _stats_kernel(p_ref, w_ref, s_ref):
    @pl.when((pl.program_id(0) == 0) & (pl.program_id(1) == 0))
    def _():
        s_ref[...] = jnp.zeros_like(s_ref)

    y0 = jnp.dot(w_ref[...], p_ref[...], preferred_element_type=jnp.float32)
    s_ref[:, 0:1] += jnp.sum(y0, axis=1, keepdims=True)
    s_ref[:, 1:2] += jnp.sum(y0 * y0, axis=1, keepdims=True)


# ---------------------------------------------------------------------------
# Forward of ConvolutionalBlock
# ---------------------------------------------------------------------------
def conv_block_forward(x, params, *, kernel_size, stride=1, batch_norm=False,
                       activation=None, tm=2048, eps=1e-5):
    """x: (N, Cin, H, W) NCHW float32. Returns (N, Cout, Ho, Wo) NCHW float32."""
    if activation is not None:
        activation = activation.lower()
        assert activation in {"prelu", "leakyrelu", "tanh"}

    w = params["w"]                              # (Cout, Cin, KH, KW)  torch layout
    b = params["b"]                              # (Cout,)
    N, Cin, H, W = x.shape
    Cout, _, KH, KW = w.shape
    P = kernel_size // 2
    Ho = (H + 2 * P - KH) // stride + 1
    Wo = (W + 2 * P - KW) // stride + 1
    HW = Ho * Wo
    K = Cin * KH * KW

    # --- glue: im2col patches built directly in bf16, lane-dense (N, K, Ho*Wo) ---
    xp = jnp.pad(x.astype(jnp.bfloat16), ((0, 0), (0, 0), (P, P), (P, P)))
    taps = []
    for dy in range(KH):
        for dx in range(KW):
            taps.append(xp[:, :,
                           dy:dy + stride * (Ho - 1) + 1:stride,
                           dx:dx + stride * (Wo - 1) + 1:stride])
    patches = jnp.stack(taps, axis=2).reshape(N, K, HW)  # k = cin*KH*KW + dy*KW + dx

    # Pad K to a bf16-safe sublane multiple (32, NOT 128) and M to the tile size.
    Kpad = _round_up(K, 32)
    tm = min(tm, _round_up(HW, 128))
    assert tm % 128 == 0
    HWpad = _round_up(HW, tm)
    n_tiles = HWpad // tm
    patches = jnp.pad(patches, ((0, 0), (0, Kpad - K), (0, HWpad - HW)))
    wmat = jnp.pad(w.reshape(Cout, K).astype(jnp.bfloat16), ((0, 0), (0, Kpad - K)))

    grid = (N, n_tiles)
    const_idx = lambda n, t: (0, 0)              # resident across the whole grid
    patch_spec = pl.BlockSpec((None, Kpad, tm), lambda n, t: (n, 0, t))
    w_spec = pl.BlockSpec((Cout, Kpad), const_idx)
    cvec_spec = pl.BlockSpec((Cout, 1), const_idx)
    out_spec = pl.BlockSpec((None, Cout, tm), lambda n, t: (n, 0, t))

    if batch_norm:
        # Pass 1: per-channel sum / sumsq of the bias-free conv output (VMEM accumulator).
        stats = pl.pallas_call(
            _stats_kernel,
            grid=grid,
            in_specs=[patch_spec, w_spec],
            out_specs=pl.BlockSpec((Cout, 2), const_idx),
            out_shape=jax.ShapeDtypeStruct((Cout, 2), jnp.float32),
            compiler_params=pltpu.CompilerParams(
                dimension_semantics=("arbitrary", "arbitrary")),
        )(patches, wmat)
        cnt = float(N * HW)
        mean0 = stats[:, 0] / cnt                                   # mean of conv w/o bias
        var = jnp.maximum(stats[:, 1] / cnt - mean0 * mean0, 0.0)   # biased (train mode)
        inv = lax.rsqrt(var + eps)
        g = params["gamma"].astype(jnp.float32)
        scale = (g * inv).reshape(Cout, 1)
        shift = (params["beta"].astype(jnp.float32) - mean0 * g * inv).reshape(Cout, 1)
        # TODO(synk): running_mean / running_var buffer updates (momentum tracking) are
        # PyTorch training side-effects and are not produced here.
    else:
        scale = jnp.ones((Cout, 1), jnp.float32)
        shift = b.astype(jnp.float32).reshape(Cout, 1)

    in_specs = [patch_spec, w_spec, cvec_spec, cvec_spec]
    inputs = [patches, wmat, scale, shift]
    if activation == "prelu":
        alpha = jnp.asarray(params["alpha"], jnp.float32).reshape(-1, 1)
        inputs.append(jnp.broadcast_to(alpha, (Cout, 1)))
        in_specs.append(cvec_spec)

    out = pl.pallas_call(
        _make_conv_affine_act_kernel(activation),
        grid=grid,
        in_specs=in_specs,
        out_specs=out_spec,
        out_shape=jax.ShapeDtypeStruct((N, Cout, HWpad), jnp.float32),
        compiler_params=pltpu.CompilerParams(
            dimension_semantics=("parallel", "parallel")),
    )(*inputs)

    return out[:, :, :HW].reshape(N, Cout, Ho, Wo)


# ---------------------------------------------------------------------------
# Pure-JAX reference (PyTorch semantics, f32) for validation
# ---------------------------------------------------------------------------
def _reference_forward(x, params, *, kernel_size, stride, batch_norm, activation, eps=1e-5):
    P = kernel_size // 2
    y = lax.conv_general_dilated(
        x.astype(jnp.float32), params["w"].astype(jnp.float32),
        window_strides=(stride, stride), padding=[(P, P), (P, P)],
        dimension_numbers=("NCHW", "OIHW", "NCHW"))
    y = y + params["b"].reshape(1, -1, 1, 1)
    if batch_norm:
        mean = jnp.mean(y, axis=(0, 2, 3), keepdims=True)
        var = jnp.mean((y - mean) ** 2, axis=(0, 2, 3), keepdims=True)   # biased
        y = (y - mean) * lax.rsqrt(var + eps)
        y = y * params["gamma"].reshape(1, -1, 1, 1) + params["beta"].reshape(1, -1, 1, 1)
    if activation == "prelu":
        y = jnp.where(y >= 0.0, y, params["alpha"] * y)
    elif activation == "leakyrelu":
        y = jnp.where(y >= 0.0, y, 0.2 * y)
    elif activation == "tanh":
        y = jnp.tanh(y)
    return y


# ---------------------------------------------------------------------------
if __name__ == "__main__":
    key = jax.random.PRNGKey(0)

    def make_params(k, cin, cout, ksz, batch_norm, activation):
        ks = jax.random.split(k, 4)
        fan_in = cin * ksz * ksz
        p = {
            "w": jax.random.normal(ks[0], (cout, cin, ksz, ksz), jnp.float32) / math.sqrt(fan_in),
            "b": 0.05 * jax.random.normal(ks[1], (cout,), jnp.float32),
        }
        if batch_norm:
            p["gamma"] = 1.0 + 0.1 * jax.random.normal(ks[2], (cout,), jnp.float32)
            p["beta"] = 0.05 * jax.random.normal(ks[3], (cout,), jnp.float32)
        if activation == "prelu":
            p["alpha"] = jnp.asarray(0.25, jnp.float32)        # PReLU default init
        return p

    kx, k1, k2, k3 = jax.random.split(key, 4)
    x = jax.random.normal(kx, (2, 4, 16, 16), jnp.float32)     # (N, Cin, H, W) NCHW

    #        name            cout ksz stride  bn     activation   tm
    configs = [
        ("k3_s1_bn_prelu",    16,  3,   1,    True,  "prelu",     128),   # BN, 2 M-tiles
        ("k5_s2_bn_tanh",     32,  5,   2,    True,  "tanh",      128),   # BN, strided, HW padding
        ("k3_s1_leakyrelu",   16,  3,   1,    False, "leakyrelu", 2048),  # no BN, tm clamped
    ]
    pkeys = [k1, k2, k3]

    for (name, cout, ksz, stride, bn, act, tile_m), pk in zip(configs, pkeys):
        params = make_params(pk, x.shape[1], cout, ksz, bn, act)
        fwd = jax.jit(functools.partial(conv_block_forward, kernel_size=ksz,
                                        stride=stride, batch_norm=bn,
                                        activation=act, tm=tile_m))
        out = jax.block_until_ready(fwd(x, params))
        ref = _reference_forward(x, params, kernel_size=ksz, stride=stride,
                                 batch_norm=bn, activation=act)
        assert out.shape == ref.shape, (name, out.shape, ref.shape)
        assert bool(jnp.all(jnp.isfinite(out))), name
        max_err = float(jnp.max(jnp.abs(out - ref)))
        assert max_err < 6e-2, (name, max_err)   # bf16 matmul + bf16-derived BN stats vs f32 ref

    print("KERNEL_OK")
</pallas_src>

<mosaic_0001>
module attributes {stable_mosaic.version = 11 : i64} {
  func.func @_stats_kernel(%arg0: i32, %arg1: i32, %arg2: memref<1x64x128xbf16, #tpu.memory_space<vmem>>, %arg3: memref<16x64xbf16, #tpu.memory_space<vmem>>, %arg4: memref<16x2xf32, #tpu.memory_space<vmem>>) attributes {dimension_semantics = [#tpu.dimension_semantics<arbitrary>, #tpu.dimension_semantics<arbitrary>], iteration_bounds = array<i64: 2, 2>, scalar_prefetch = 0 : i64, scratch_operands = 0 : i64, tpu.core_type = #tpu.core_type<tc>, window_params = [{transform_indices = @transform_0, window_bounds = array<i64: 1, 64, 128>}, {pipeline_mode = #tpu.pipeline_mode<synchronous>, transform_indices = @transform_1, window_bounds = array<i64: 16, 64>}, {pipeline_mode = #tpu.pipeline_mode<synchronous>, transform_indices = @transform_2, window_bounds = array<i64: 16, 2>}]} {
    %c0_i32 = arith.constant 0 : i32
    %0 = arith.cmpi eq, %arg0, %c0_i32 : i32
    %c0_i32_0 = arith.constant 0 : i32
    %1 = arith.cmpi eq, %arg1, %c0_i32_0 : i32
    %2 = arith.andi %0, %1 : i1
    %3 = arith.extui %2 : i1 to i32
    %c0_i32_1 = arith.constant 0 : i32
    %4 = arith.cmpi ne, %3, %c0_i32_1 : i32
    scf.if %4 {
      %cst_15 = arith.constant 0.000000e+00 : f32
      %20 = vector.broadcast %cst_15 : f32 to vector<16x2xf32>
      %c0_16 = arith.constant 0 : index
      %c0_17 = arith.constant 0 : index
      %21 = vector.load %arg4[%c0_16, %c0_17] : memref<16x2xf32, #tpu.memory_space<vmem>>, vector<16x2xf32>
      tpu.vector_store %arg4[%c0_16, %c0_17], %20 {strides = array<i32>} : memref<16x2xf32, #tpu.memory_space<vmem>>, vector<16x2xf32>,
    } else {
    }
    %c0 = arith.constant 0 : index
    %c0_2 = arith.constant 0 : index
    %5 = vector.load %arg3[%c0, %c0_2] : memref<16x64xbf16, #tpu.memory_space<vmem>>, vector<16x64xbf16>
    %c0_3 = arith.constant 0 : index
    %c0_4 = arith.constant 0 : index
    %c0_5 = arith.constant 0 : index
    %6 = vector.load %arg2[%c0_3, %c0_4, %c0_5] : memref<1x64x128xbf16, #tpu.memory_space<vmem>>, vector<1x64x128xbf16>
    %7 = vector.shape_cast %6 : vector<1x64x128xbf16> to vector<64x128xbf16>
    %cst = arith.constant dense<0.000000e+00> : vector<16x128xf32>
    %8 = tpu.matmul %5, %7, %cst {dimension_numbers = #tpu.dot_dimension_numbers<[1], [0], [0], [1], [0, 0, 1, 1], [], []>} : vector<16x64xbf16>, vector<64x128xbf16>, vector<16x128xf32> -> vector<16x128xf32>
    %c0_6 = arith.constant 0 : index
    %c0_7 = arith.constant 0 : index
    %9 = vector.load %arg4[%c0_6, %c0_7] : memref<16x2xf32, #tpu.memory_space<vmem>>, vector<16x1xf32>
    %cst_8 = arith.constant dense<0.000000e+00> : vector<16xf32>
    %10 = vector.multi_reduction <add>, %8, %cst_8 [1] : vector<16x128xf32> to vector<16xf32>
    %11 = vector.shape_cast %10 : vector<16xf32> to vector<16x1xf32>
    %12 = arith.addf %9, %11 : vector<16x1xf32>
    %c0_9 = arith.constant 0 : index
    %c0_10 = arith.constant 0 : index
    %13 = vector.load %arg4[%c0_9, %c0_10] : memref<16x2xf32, #tpu.memory_space<vmem>>, vector<16x1xf32>
    tpu.vector_store %arg4[%c0_9, %c0_10], %12 {strides = array<i32>} : memref<16x2xf32, #tpu.memory_space<vmem>>, vector<16x1xf32>,
    %c0_11 = arith.constant 0 : index
    %c1 = arith.constant 1 : index
    %14 = vector.load %arg4[%c0_11, %c1] : memref<16x2xf32, #tpu.memory_space<vmem>>, vector<16x1xf32>
    %15 = arith.mulf %8, %8 : vector<16x128xf32>
    %cst_12 = arith.constant dense<0.000000e+00> : vector<16xf32>
    %16 = vector.multi_reduction <add>, %15, %cst_12 [1] : vector<16x128xf32> to vector<16xf32>
    %17 = vector.shape_cast %16 : vector<16xf32> to vector<16x1xf32>
    %18 = arith.addf %14, %17 : vector<16x1xf32>
    %c0_13 = arith.constant 0 : index
    %c1_14 = arith.constant 1 : index
    %19 = vector.load %arg4[%c0_13, %c1_14] : memref<16x2xf32, #tpu.memory_space<vmem>>, vector<16x1xf32>
    tpu.vector_store %arg4[%c0_13, %c1_14], %18 {strides = array<i32>} : memref<16x2xf32, #tpu.memory_space<vmem>>, vector<16x1xf32>,
    return
  }
  func.func @transform_0(%arg0: i32, %arg1: i32) -> (i32, i32, i32) {
    %c0_i32 = arith.constant 0 : i32
    %c0_i32_0 = arith.constant 0 : i32
    return %arg0, %c0_i32, %arg1 : i32, i32, i32
  }
  func.func @transform_1(%arg0: i32, %arg1: i32) -> (i32, i32) {
    %c0_i32 = arith.constant 0 : i32
    %c0_i32_0 = arith.constant 0 : i32
    %c0_i32_1 = arith.constant 0 : i32
    return %c0_i32, %c0_i32_0 : i32, i32
  }
  func.func @transform_2(%arg0: i32, %arg1: i32) -> (i32, i32) {
    %c0_i32 = arith.constant 0 : i32
    %c0_i32_0 = arith.constant 0 : i32
    %c0_i32_1 = arith.constant 0 : i32
    return %c0_i32, %c0_i32_0 : i32, i32
  }
}

module attributes {stable_mosaic.version = 11 : i64} {
  func.func @kernel(%arg0: i32, %arg1: i32, %arg2: memref<1x64x128xbf16, #tpu.memory_space<vmem>>, %arg3: memref<16x64xbf16, #tpu.memory_space<vmem>>, %arg4: memref<16x1xf32, #tpu.memory_space<vmem>>, %arg5: memref<16x1xf32, #tpu.memory_space<vmem>>, %arg6: memref<16x1xf32, #tpu.memory_space<vmem>>, %arg7: memref<1x16x128xf32, #tpu.memory_space<vmem>>) attributes {dimension_semantics = [#tpu.dimension_semantics<parallel>, #tpu.dimension_semantics<parallel>], iteration_bounds = array<i64: 2, 2>, scalar_prefetch = 0 : i64, scratch_operands = 0 : i64, tpu.core_type = #tpu.core_type<tc>, window_params = [{transform_indices = @transform_0, window_bounds = array<i64: 1, 64, 128>}, {pipeline_mode = #tpu.pipeline_mode<synchronous>, transform_indices = @transform_1, window_bounds = array<i64: 16, 64>}, {pipeline_mode = #tpu.pipeline_mode<synchronous>, transform_indices = @transform_2, window_bounds = array<i64: 16, 1>}, {pipeline_mode = #tpu.pipeline_mode<synchronous>, transform_indices = @transform_3, window_bounds = array<i64: 16, 1>}, {pipeline_mode = #tpu.pipeline_mode<synchronous>, transform_indices = @transform_4, window_bounds = array<i64: 16, 1>}, {transform_indices = @transform_5, window_bounds = array<i64: 1, 16, 128>}]} {
    %c0 = arith.constant 0 : index
    %c0_0 = arith.constant 0 : index
    %0 = vector.load %arg3[%c0, %c0_0] : memref<16x64xbf16, #tpu.memory_space<vmem>>, vector<16x64xbf16>
    %c0_1 = arith.constant 0 : index
    %c0_2 = arith.constant 0 : index
    %c0_3 = arith.constant 0 : index
    %1 = vector.load %arg2[%c0_1, %c0_2, %c0_3] : memref<1x64x128xbf16, #tpu.memory_space<vmem>>, vector<1x64x128xbf16>
    %2 = vector.shape_cast %1 : vector<1x64x128xbf16> to vector<64x128xbf16>
    %cst = arith.constant dense<0.000000e+00> : vector<16x128xf32>
    %3 = tpu.matmul %0, %2, %cst {dimension_numbers = #tpu.dot_dimension_numbers<[1], [0], [0], [1], [0, 0, 1, 1], [], []>} : vector<16x64xbf16>, vector<64x128xbf16>, vector<16x128xf32> -> vector<16x128xf32>
    %c0_4 = arith.constant 0 : index
    %c0_5 = arith.constant 0 : index
    %4 = vector.load %arg4[%c0_4, %c0_5] : memref<16x1xf32, #tpu.memory_space<vmem>>, vector<16x1xf32>
    %5 = vector.broadcast %4 : vector<16x1xf32> to vector<16x128xf32>
    %6 = arith.mulf %3, %5 : vector<16x128xf32>
    %c0_6 = arith.constant 0 : index
    %c0_7 = arith.constant 0 : index
    %7 = vector.load %arg5[%c0_6, %c0_7] : memref<16x1xf32, #tpu.memory_space<vmem>>, vector<16x1xf32>
    %8 = vector.broadcast %7 : vector<16x1xf32> to vector<16x128xf32>
    %9 = arith.addf %6, %8 : vector<16x128xf32>
    %c0_8 = arith.constant 0 : index
    %c0_9 = arith.constant 0 : index
    %10 = vector.load %arg6[%c0_8, %c0_9] : memref<16x1xf32, #tpu.memory_space<vmem>>, vector<16x1xf32>
    %cst_10 = arith.constant 0.000000e+00 : f32
    %11 = vector.broadcast %cst_10 : f32 to vector<16x128xf32>
    %12 = arith.cmpf oge, %9, %11 : vector<16x128xf32>
    %13 = vector.broadcast %10 : vector<16x1xf32> to vector<16x128xf32>
    %14 = arith.mulf %13, %9 : vector<16x128xf32>
    %15 = arith.select %12, %9, %14 : vector<16x128xi1>, vector<16x128xf32>
    %c0_11 = arith.constant 0 : index
    %c0_12 = arith.constant 0 : index
    %c0_13 = arith.constant 0 : index
    %16 = vector.load %arg7[%c0_11, %c0_12, %c0_13] : memref<1x16x128xf32, #tpu.memory_space<vmem>>, vector<1x16x128xf32>
    %17 = vector.shape_cast %16 : vector<1x16x128xf32> to vector<16x128xf32>
    %18 = vector.shape_cast %15 : vector<16x128xf32> to vector<1x16x128xf32>
    tpu.vector_store %arg7[%c0_11, %c0_12, %c0_13], %18 {strides = array<i32>} : memref<1x16x128xf32, #tpu.memory_space<vmem>>, vector<1x16x128xf32>,
    return
  }
  func.func @transform_0(%arg0: i32, %arg1: i32) -> (i32, i32, i32) {
    %c0_i32 = arith.constant 0 : i32
    %c0_i32_0 = arith.constant 0 : i32
    return %arg0, %c0_i32, %arg1 : i32, i32, i32
  }
  func.func @transform_1(%arg0: i32, %arg1: i32) -> (i32, i32) {
    %c0_i32 = arith.constant 0 : i32
    %c0_i32_0 = arith.constant 0 : i32
    %c0_i32_1 = arith.constant 0 : i32
    return %c0_i32, %c0_i32_0 : i32, i32
  }
  func.func @transform_2(%arg0: i32, %arg1: i32) -> (i32, i32) {
    %c0_i32 = arith.constant 0 : i32
    %c0_i32_0 = arith.constant 0 : i32
    %c0_i32_1 = arith.constant 0 : i32
    return %c0_i32, %c0_i32_0 : i32, i32
  }
  func.func @transform_3(%arg0: i32, %arg1: i32) -> (i32, i32) {
    %c0_i32 = arith.constant 0 : i32
    %c0_i32_0 = arith.constant 0 : i32
    %c0_i32_1 = arith.constant 0 : i32
    return %c0_i32, %c0_i32_0 : i32, i32
  }
  func.func @transform_4(%arg0: i32, %arg1: i32) -> (i32, i32) {
    %c0_i32 = arith.constant 0 : i32
    %c0_i32_0 = arith.constant 0 : i32
    %c0_i32_1 = arith.constant 0 : i32
    return %c0_i32, %c0_i32_0 : i32, i32
  }
  func.func @transform_5(%arg0: i32, %arg1: i32) -> (i32, i32, i32) {
    %c0_i32 = arith.constant 0 : i32
    %c0_i32_0 = arith.constant 0 : i32
    return %arg0, %c0_i32, %arg1 : i32, i32, i32
  }
}

</mosaic_0001>

<bundles_post_ra>
// kernel: conv_block_forward.3
= control target key start
LH: loop header
LB: loop body
LE: loop exit
PB: predicated region body
PF: predicated region fallthrough
CT: control target
= control target key end

     0   :  { %s751_s18 = smov 0   ;;  %s753_s19 = smov 0   ;;  %s872_s0 = inlined_call_operand.vmem [shape: bf16[2,64,256], index: 0, kind: input, shape index: {}]   ;;  %s873_s1 = inlined_call_operand.vmem [shape: bf16[16,64], index: 1, kind: input, shape index: {}]   ;;  %s874_s2 = inlined_call_operand.vmem [shape: f32[16,1], index: 2, kind: input, shape index: {}]   ;;  %s875_s3 = inlined_call_operand.vmem [shape: f32[16,1], index: 3, kind: input, shape index: {}]   ;;  %s876_s4 = inlined_call_operand.vmem [shape: f32[16,1], index: 4, kind: input, shape index: {}]   ;;  %s877_s5 = inlined_call_operand.vmem [shape: f32[2,16,256], index: 5, kind: output, shape index: {}]  }
   0x1   :  { %s755_s20 = smov 0   ;;  %s757_s21 = smov 0  }
   0x2   :  { %s759_s22 = smov 0   ;;  %s761_s23 = smov 0  }
   0x3   :  { %s763_s24 = smov 0  }
   0x4 LB: > { %s24_s25 = sadd.s32 1, %s708_s22  ;;  %s27_s26 = sadd.s32 1, %s712_s23  ;;  %s716_s24 = sphi %s763_s24, %s15_s24   ;;  %s712_s23 = sphi %s761_s23, %s884_s23   ;;  %s708_s22 = sphi %s759_s22, %s883_s22   ;;  %s704_s21 = sphi %s757_s21, %s882_s21   ;;  %s700_s20 = sphi %s755_s20, %s881_s20   ;;  %s696_s19 = sphi %s753_s19, %s880_s19   ;;  %s692_s18 = sphi %s751_s18, %s879_s18  }
   0x5   : > { %p25_p0 = scmp.ge.s32.totalorder %s24_s25, 2  ;;  %s558_s27 = sadd.s32 4294967295, %s716_s24  }
   0x6   : > { %p43_p1 = scmp.ne.s32.totalorder %s696_s19, %s692_s18  ;;  %p44_p2 = scmp.eq.s32.totalorder %s716_s24, 0 }
   0x7   : > { %s886_s25 = smov (%p25_p0, %s24_s25), 0  ;;  %s888_s26 = smov (!%p25_p0, %s27_s26), %s712_s23 }
   0x8   : > { %p29_p3 = scmp.ge.s32.totalorder %s888_s26, 2  ;;  %p159_p4 = scmp.eq.s32.totalorder %s558_s27, 3 }
   0x9   : > { %s32_s28 = ssub.s32 %s708_s22, %s886_s25  ;;  %p45_p5 = por %p44_p2, %p43_p1 }
   0xa   : > { %s890_s26 = smov (%p29_p3, %s888_s26), 0  ;;  %p799_p6 = por %p159_p4, %p43_p1 }
   0xb   : > { %s31_s30 = ssub.s32 %s712_s23, %s890_s26  ;;  %s36_s7 = sadd.s32 1, %s696_s19 }
   0xc   : > { %s33_s6 = sor.u32 %s32_s28, %s31_s30  ;;  %p561_p8 = scmp.ge.s32.totalorder %s716_s24, 4 }
   0xd   : > { %p34_p7 = scmp.eq.s32.totalorder %s33_s6, 0 }
   0xe   : > { %193 = sbr.rel (%p561_p8) target bundleno = 32 (0x20), region = 32 }
   0xf   : > { %s807_s8 = scalar_select %p34_p7, %s696_s19, %s36_s7  }
  0x15   : > { %196 = sbr.rel (!%p45_p5) target bundleno = 32 (0x20), region = 36  ;;  %s198_s9 = sand.u32 (%p45_p5), 1, %s696_s19  }
  0x16   : > { %s563_s10 = sshll.u32 (%p45_p5), %s712_s23, 4  ;;  %s562_s11 = sshll.u32 (%p45_p5), %s198_s9, 5 }
  0x17   : > { %s202_s12 = sadd.s32 (%p45_p5), %s708_s22, %s563_s10  ;;  %s200_s17 = scalar_lea.vmem (%p45_p5), [#allocation2], %s562_s11 }
  0x18   : > { %s564_s13 = sshll.u32 (%p45_p5), %s202_s12, 2 }
  0x19   : > { %s204_s16 = scalar_lea.vmem (%p45_p5), %s872_s0, %s564_s13 }
  0x1a   : > { %v220_v0 = vld [vmem:[%s204_s16] sm:$0xf] (%p45_p5)  ;;  %v222_v1 = vld [vmem:[%s204_s16 + $0x8] sm:$0xf] (%p45_p5)  ;;  %v224_v2 = vld [vmem:[%s204_s16 + $0x10] sm:$0xf] (%p45_p5) }
  0x1b   : > { %221 = vst [vmem:[%s200_s17] sm:$0xf] (%p45_p5), %v220_v0  ;;  %223 = vst [vmem:[%s200_s17 + $0x4] sm:$0xf] (%p45_p5), %v222_v1  ;;  %v226_v3 = vld [vmem:[%s204_s16 + $0x18] sm:$0xf] (%p45_p5) }
  0x1c   : > { %225 = vst [vmem:[%s200_s17 + $0x8] sm:$0xf] %v224_v2  ;;  %v228_v4 = vld [vmem:[%s204_s16 + $0x20] sm:$0xf]  ;;  %v230_v5 = vld [vmem:[%s204_s16 + $0x28] sm:$0xf] }
  0x1d   : > { %227 = vst [vmem:[%s200_s17 + $0xc] sm:$0xf] %v226_v3  ;;  %229 = vst [vmem:[%s200_s17 + $0x10] sm:$0xf] %v228_v4  ;;  %v232_v6 = vld [vmem:[%s204_s16 + $0x30] sm:$0xf] }
  0x1e   : > { %231 = vst [vmem:[%s200_s17 + $0x14] sm:$0xf] %v230_v5  ;;  %v234_v7 = vld [vmem:[%s204_s16 + $0x38] sm:$0xf]  ;;  %233 = vst [vmem:[%s200_s17 + $0x18] sm:$0xf] %v232_v6 }
  0x1f   : > { %235 = vst [vmem:[%s200_s17 + $0x1c] sm:$0xf] %v234_v7 }
  0x20 PF: > { %p565_p9 = scmp.ge.s32.totalorder %s716_s24, 1  ;;  %p273_p10 = scmp.lt.s32.totalorder %s716_s24, 5 }
  0x22   : > { %p274_p11 = pnand %p565_p9, %p273_p10 }
  0x23   : > { %s280_s27 = sand.u32 (!%p274_p11), 1, %s692_s18   ;;  %v718_v8 = vmov (!%p274_p11), 0.0   ;;  %vm719_vm0 = vmmov (!%p274_p11), 0   ;;  %v405_v9 = vld [vmem:[%s875_s3] sm:$0xff] (!%p274_p11)  ;;  %v720_v10 = vmov (!%p274_p11), 0   ;;  %v406_v12 = vld [vmem:[%s875_s3 + $0x8] sm:$0xff] (!%p274_p11) }
  0x24   : > { %277 = sbr.rel (%p274_p11) target bundleno = 284 (0x11c), region = 77  ;;  %584 = vmatprep.subr.bf16.mxu0 (!%p274_p11), %v718_v8  ;;  %s566_s28 = sshll.u32 (!%p274_p11), %s280_s27, 5  ;;  %592 = vmatprep.mubr.msk.bf16.mxu0 (!%p274_p11), %vm719_vm0, %v718_v8  ;;  %v391_v11 = vld [vmem:[%s874_s2] sm:$0xff] (!%p274_p11)  ;;  %v392_v14 = vld [vmem:[%s874_s2 + $0x8] sm:$0xff] (!%p274_p11)  ;;  %vm346_vm1 = vcmask (!%p274_p11), 523264  }
  0x25   : > { %656 = vset.pattern.permute.xlu1 (!%p274_p11), %v720_v10  ;;  %655 = vset.pattern.permute.xlu0 (!%p274_p11), %v720_v10  ;;  %s282_s12 = scalar_lea.vmem (!%p274_p11), [#allocation2], %s566_s28  ;;  %v420_v16 = vld [vmem:[%s876_s4 + $0x8] sm:$0xff] (!%p274_p11)  ;;  %v419_v17 = vld [vmem:[%s876_s4] sm:$0xff] (!%p274_p11)  ;;  %s567_s7 = sshll.u32 (!%p274_p11), %s280_s27, 4 }
  0x26   : > { %v657_v13 = vld [vmem:[%s282_s12] sm:$0xff] (!%p274_p11)   ;;  %409 = vperm.xlu1 (!%p274_p11), %656, %v405_v9   ;;  %395 = vperm.xlu0 (!%p274_p11), %655, %v391_v11   ;;  %v658_v15 = vld [vmem:[%s282_s12 + $0x8] sm:$0xff] (!%p274_p11)   ;;  %v659_v18 = vld [vmem:[%s282_s12 + $0x10] sm:$0xff] (!%p274_p11)   ;;  %s305_s9 = scalar_lea.vmem (!%p274_p11), [#allocation3], %s567_s7 }
  0x27   : > { %585 = vmatpush3.bf16.msra.mxu0 (!%p274_p11), %v657_v13  ;;  %v660_v19 = vld [vmem:[%s282_s12 + $0x18] sm:$0xff] (!%p274_p11)   ;;  %v661_v20 = vld [vmem:[%s873_s1] sm:$0xff] (!%p274_p11)  }
  0x28   : > { %586 = vmatprep.subr.bf16.mxu0 (!%p274_p11), %v718_v8 }
  0x2a   : > { %414 = vperm.xlu1 (!%p274_p11), %656, %v406_v12   ;;  %400 = vperm.xlu0 (!%p274_p11), %655, %v392_v14  }
  0x2b   : > { %587 = vmatpush3.bf16.msra.mxu0 %v658_v15  ;;  %s575_s18 = sshll.u32 (%p799_p6), %s704_s21, 2 }
  0x2c   : > { %588 = vmatprep.subr.bf16.mxu0 %v718_v8  ;;  %s447_s27 = sadd.s32 (%p799_p6), %s700_s20, %s575_s18 }
  0x2d   : > { %s576_s10 = sshll.u32 (%p799_p6), %s447_s27, 3 }
  0x2e   : > { %430 = vperm.xlu1 %656, %v420_v16   ;;  %425 = vperm.xlu0 %655, %v419_v17   ;;  %s449_s13 = scalar_lea.vmem (%p799_p6), %s877_s5, %s576_s10 }
  0x2f   : > { %589 = vmatpush3.bf16.msra.mxu0 %v659_v18 }
  0x30   : > { %590 = vmatprep.subr.bf16.mxu0 %v718_v8 }
  0x33   : > { %591 = vmatpush3.bf16.msra.mxu0 %v660_v19 }
  0x36   : > { %593 = vmatmul.mubr.msk.bf16.vlgmr.msra.gmra.mrb[0].mxu0 %vm346_vm1, %v661_v20 }
  0xa5   : > { %v396_v21 = vpop.permute.xlu0 %395  ;;  %v410_v22 = vpop.permute.xlu1 %409 }
  0xa9   : > { %v401_v23 = vpop.permute.xlu0 %400  ;;  %v415_v24 = vpop.permute.xlu1 %414 }
  0xad   : > { %v426_v32 = vpop.permute.xlu0 %425  ;;  %v431_v35 = vpop.permute.xlu1 %430 }
 0x109   : > { %v384_v25 = vpop.f32.mrb[0].mxu0 }
 0x10a   : > { %v403_v26 = vmul.f32 %v396_v21, %v384_v25  ;;  %v594_v27 = vpop.f32.mrb[1].mxu0 }
 0x10b   : > { %v387_v28 = vpop.f32.mrb[2].mxu0 }
 0x10c   : > { %v417_v29 = vadd.f32 %v410_v22, %v403_v26  ;;  %v404_v30 = vmul.f32 %v401_v23, %v387_v28  ;;  %v595_v31 = vpop.f32.mrb[3].mxu0 }
 0x10d   : > { %445 = sbr.rel (!%p799_p6) target bundleno = 284 (0x11c), region = 85 }
 0x10e   : > { %vm421_vm2 = vcmp.ge.f32.partialorder %v417_v29, 0.0  ;;  %v433_v33 = vmul.f32 %v426_v32, %v417_v29  ;;  %v418_v34 = vadd.f32 %v415_v24, %v404_v30 }
 0x110   : > { %v435_v36 = vsel %vm421_vm2, %v417_v29, %v433_v33  ;;  %vm422_vm3 = vcmp.ge.f32.partialorder %v418_v34, 0.0  ;;  %v434_v37 = vmul.f32 %v431_v35, %v418_v34 }
 0x111   : > { %437 = vst [vmem:[%s305_s9] sm:$0xff] %v435_v36 }
 0x112   : > { %v436_v38 = vsel %vm422_vm3, %v418_v34, %v434_v37 }
 0x113   : > { %438 = vst [vmem:[%s305_s9 + $0x8] sm:$0xff] %v436_v38 }
 0x118   : > { %v479_v39 = vld [vmem:[%s305_s9] sm:$0xff] }
 0x119   : > { %480 = vst [vmem:[%s449_s13] sm:$0xff] %v479_v39 }
 0x11a   : > { %v481_v40 = vld [vmem:[%s305_s9 + $0x8] sm:$0xff] }
 0x11b   : > { %482 = vst [vmem:[%s449_s13 + $0x10] sm:$0xff] %v481_v40 }
 0x11c PF: > { %s15_s24 = sadd.s32 1, %s716_s24   ;;  %s879_s18 = smov %s696_s19 }
 0x11d   : > { %p12_p12 = scmp.ge.s32.totalorder %s15_s24, 6   ;;  %s880_s19 = smov %s807_s8 }
 0x11e   : > { %s881_s20 = smov %s708_s22  ;;  %s882_s21 = smov %s712_s23 }
 0x11f   : > { %s883_s22 = smov %s886_s25  ;;  %s884_s23 = smov %s890_s26 }
 0x120   :  { %14 = sbr.rel (!%p12_p12) target bundleno = 4 (0x4), region = 154 }

// kernel: conv_block_forward.2
= control target key start
LH: loop header
LB: loop body
LE: loop exit
PB: predicated region body
PF: predicated region fallthrough
CT: control target
= control target key end

     0   :  { %s550_s9 = smov 0   ;;  %s552_s10 = smov 0   ;;  %s669_s0 = inlined_call_operand.vmem [shape: bf16[2,64,256], index: 0, kind: input, shape index: {}]   ;;  %s670_s1 = inlined_call_operand.vmem [shape: bf16[16,64], index: 1, kind: input, shape index: {}]   ;;  %s671_s2 = inlined_call_operand.vmem [shape: f32[16,2], index: 2, kind: output, shape index: {}]  }
   0x1   :  { %s554_s11 = smov 0   ;;  %s556_s12 = smov 0  }
   0x2   :  { %s558_s13 = smov 0   ;;  %s560_s14 = smov 0  }
   0x3   :  { %s562_s15 = smov 0  }
   0x4 LB: > { %s21_s16 = sadd.s32 1, %s522_s13  ;;  %s24_s17 = sadd.s32 1, %s526_s14  ;;  %s530_s15 = sphi %s562_s15, %s12_s15   ;;  %s526_s14 = sphi %s560_s14, %s677_s14   ;;  %s522_s13 = sphi %s558_s13, %s676_s13   ;;  %s518_s12 = sphi %s556_s12, %s675_s12   ;;  %s514_s11 = sphi %s554_s11, %s674_s11   ;;  %s510_s10 = sphi %s552_s10, %s673_s10   ;;  %s506_s9 = sphi %s550_s9, %s672_s9  }
   0x5   : > { %p22_p0 = scmp.ge.s32.totalorder %s21_s16, 2  ;;  %p40_p1 = scmp.ne.s32.totalorder %s510_s10, %s506_s9 }
   0x6   : > { %p41_p2 = scmp.eq.s32.totalorder %s530_s15, 0  ;;  %s33_s21 = sadd.s32 1, %s510_s10 }
   0x7   : > { %s679_s16 = smov (%p22_p0, %s21_s16), 0  ;;  %s681_s17 = smov (!%p22_p0, %s24_s17), %s526_s14 }
   0x8   : > { %p42_p3 = por %p41_p2, %p40_p1  ;;  %p26_p4 = scmp.ge.s32.totalorder %s681_s17, 2 }
   0x9   : > { %s29_s18 = ssub.s32 %s522_s13, %s679_s16  ;;  %p381_p6 = scmp.ge.s32.totalorder %s530_s15, 4 }
   0xa   : > { %s683_s17 = smov (%p26_p4, %s681_s17), 0 }
   0xb   : > { %s28_s19 = ssub.s32 %s526_s14, %s683_s17  ;;  %111 = sbr.rel (%p381_p6) target bundleno = 29 (0x1d), region = 20 }
   0xc   : > { %s30_s20 = sor.u32 %s29_s18, %s28_s19 }
   0xd   : > { %p31_p5 = scmp.eq.s32.totalorder %s30_s20, 0 }
   0xf   : > { %s601_s22 = scalar_select %p31_p5, %s510_s10, %s33_s21  }
  0x12   : > { %114 = sbr.rel (!%p42_p3) target bundleno = 29 (0x1d), region = 24  ;;  %s116_s23 = sand.u32 (%p42_p3), 1, %s510_s10  }
  0x13   : > { %s383_s24 = sshll.u32 (%p42_p3), %s526_s14, 4  ;;  %s382_s25 = sshll.u32 (%p42_p3), %s116_s23, 5 }
  0x14   : > { %s120_s26 = sadd.s32 (%p42_p3), %s522_s13, %s383_s24  ;;  %s118_s3 = scalar_lea.vmem (%p42_p3), [#allocation2], %s382_s25 }
  0x15   : > { %s384_s27 = sshll.u32 (%p42_p3), %s120_s26, 2 }
  0x16   : > { %s122_s30 = scalar_lea.vmem (%p42_p3), %s669_s0, %s384_s27 }
  0x17   : > { %v138_v0 = vld [vmem:[%s122_s30] sm:$0xf] (%p42_p3)  ;;  %v140_v1 = vld [vmem:[%s122_s30 + $0x8] sm:$0xf] (%p42_p3)  ;;  %v142_v2 = vld [vmem:[%s122_s30 + $0x10] sm:$0xf] (%p42_p3) }
  0x18   : > { %139 = vst [vmem:[%s118_s3] sm:$0xf] (%p42_p3), %v138_v0  ;;  %141 = vst [vmem:[%s118_s3 + $0x4] sm:$0xf] (%p42_p3), %v140_v1  ;;  %v144_v3 = vld [vmem:[%s122_s30 + $0x18] sm:$0xf] (%p42_p3) }
  0x19   : > { %143 = vst [vmem:[%s118_s3 + $0x8] sm:$0xf] %v142_v2  ;;  %v146_v4 = vld [vmem:[%s122_s30 + $0x20] sm:$0xf]  ;;  %v148_v5 = vld [vmem:[%s122_s30 + $0x28] sm:$0xf] }
  0x1a   : > { %145 = vst [vmem:[%s118_s3 + $0xc] sm:$0xf] %v144_v3  ;;  %147 = vst [vmem:[%s118_s3 + $0x10] sm:$0xf] %v146_v4  ;;  %v150_v6 = vld [vmem:[%s122_s30 + $0x30] sm:$0xf] }
  0x1b   : > { %149 = vst [vmem:[%s118_s3 + $0x14] sm:$0xf] %v148_v5  ;;  %v152_v7 = vld [vmem:[%s122_s30 + $0x38] sm:$0xf]  ;;  %151 = vst [vmem:[%s118_s3 + $0x18] sm:$0xf] %v150_v6 }
  0x1c   : > { %153 = vst [vmem:[%s118_s3 + $0x1c] sm:$0xf] %v152_v7 }
  0x1d PF: > { %p385_p7 = scmp.ge.s32.totalorder %s530_s15, 1  ;;  %p191_p8 = scmp.lt.s32.totalorder %s530_s15, 5 }
  0x1f   : > { %p192_p9 = pnand %p385_p7, %p191_p8 }
  0x20   : > { %s198_s4 = sand.u32 (!%p192_p9), 1, %s506_s9   ;;  %p215_p10 = scmp.eq.s32.totalorder (!%p192_p9), %s518_s12, 0 }
  0x21   : > { %195 = sbr.rel (%p192_p9) target bundleno = 435 (0x1b3), region = 65  ;;  %s386_s5 = sshll.u32 (!%p192_p9), %s198_s4, 5 }
  0x22   : > { %p216_p11 = scmp.eq.s32.totalorder (!%p192_p9), %s514_s11, 0  ;;  %s200_s6 = scalar_lea.vmem (!%p192_p9), [#allocation2], %s386_s5 }
  0x24   : > { %p217_p12 = pnand (!%p192_p9), %p216_p11, %p215_p10 }
  0x28   : > { %220 = sbr.rel (%p217_p12) target bundleno = 47 (0x2f), region = 73  ;;  %vm221_vm0 = vcmask (!%p217_p12), 15360   ;;  %v532_v8 = vmov (!%p217_p12), 0.0  }
  0x29   : > { %222 = vst.msk [vmem:[%s671_s2] sm:$0xff] (!%p217_p12), %vm221_vm0, %v532_v8  ;;  %223 = vst.msk [vmem:[%s671_s2 + $0x8] sm:$0xff] (!%p217_p12), %vm221_vm0, %v532_v8 }
  0x2f PF: > { %v471_v9 = vld [vmem:[%s200_s6] sm:$0xff]   ;;  %v533_v10 = vmov 0.0   ;;  %v472_v11 = vld [vmem:[%s200_s6 + $0x8] sm:$0xff]   ;;  %vm534_vm1 = vmmov 0   ;;  %v473_v12 = vld [vmem:[%s200_s6 + $0x10] sm:$0xff]   ;;  %vm263_vm2 = vcmask 523264  }
  0x30   : > { %400 = vmatprep.subr.bf16.mxu0 %v533_v10  ;;  %408 = vmatprep.mubr.msk.bf16.mxu0 %vm534_vm1, %v533_v10  ;;  %v474_v13 = vld [vmem:[%s200_s6 + $0x18] sm:$0xff]   ;;  %v475_v14 = vld [vmem:[%s670_s1] sm:$0xff]   ;;  %vm316_vm3 = vcmask 7168   ;;  %v309_v24 = vld [vmem:[%s671_s2 + $0x8] sm:$0xff]  ;;  %vm329_vm4 = vcmask 15368  }
  0x31   : > { %401 = vmatpush3.bf16.msra.mxu0 %v471_v9  ;;  %v308_v21 = vld [vmem:[%s671_s2] sm:$0xff] }
  0x32   : > { %402 = vmatprep.subr.bf16.mxu0 %v533_v10 }
  0x35   : > { %403 = vmatpush3.bf16.msra.mxu0 %v472_v11 }
  0x36   : > { %404 = vmatprep.subr.bf16.mxu0 %v533_v10 }
  0x39   : > { %405 = vmatpush3.bf16.msra.mxu0 %v473_v12 }
  0x3a   : > { %406 = vmatprep.subr.bf16.mxu0 %v533_v10 }
  0x3d   : > { %407 = vmatpush3.bf16.msra.mxu0 %v474_v13 }
  0x40   : > { %409 = vmatmul.mubr.msk.bf16.vlgmr.msra.gmra.mrb[0].mxu0 %vm263_vm2, %v475_v14 }
 0x113   : > { %v301_v15 = vpop.f32.mrb[0].mxu0 }
 0x114   : > { %310 = vadd.xlane.f32.xlu0 %v301_v15  ;;  %v410_v16 = vpop.f32.mrb[1].mxu0  ;;  %v321_v17 = vmul.f32 %v301_v15, %v301_v15 }
 0x115   : > { %v304_v18 = vpop.f32.mrb[2].mxu0 }
 0x116   : > { %323 = vadd.xlane.f32.xlu1 %v321_v17  ;;  %v411_v19 = vpop.f32.mrb[3].mxu0  ;;  %v322_v20 = vmul.f32 %v304_v18, %v304_v18 }
 0x118   : > { %312 = vadd.xlane.f32.xlu0 %v304_v18 }
 0x11a   : > { %325 = vadd.xlane.f32.xlu1 %v322_v20 }
 0x1a1   : > { %v311_v22 = vpop.xlane.xlu0 %310 }
 0x1a2   : > { %v314_v23 = vadd.f32 %v311_v22, %v308_v21 }
 0x1a3   : > { %v324_v27 = vpop.xlane.xlu1 %323 }
 0x1a4   : > { %317 = vst.msk [vmem:[%s671_s2] sm:$0xff] %vm316_vm3, %v314_v23 }
 0x1a5   : > { %v313_v25 = vpop.xlane.xlu0 %312 }
 0x1a6   : > { %v315_v26 = vadd.f32 %v313_v25, %v309_v24 }
 0x1a7   : > { %v326_v31 = vpop.xlane.xlu1 %325 }
 0x1a8   : > { %318 = vst.msk [vmem:[%s671_s2 + $0x8] sm:$0xff] %vm316_vm3, %v315_v26 }
 0x1ab   : > { %v319_v28 = vld [vmem:[%s671_s2] sm:$0xff] }
 0x1ac   : > { %v327_v29 = vadd.f32 %v324_v27, %v319_v28 }
 0x1ae   : > { %330 = vst.msk [vmem:[%s671_s2] sm:$0xff] %vm329_vm4, %v327_v29 }
 0x1af   : > { %v320_v30 = vld [vmem:[%s671_s2 + $0x8] sm:$0xff] }
 0x1b0   : > { %v328_v32 = vadd.f32 %v326_v31, %v320_v30 }
 0x1b2   : > { %331 = vst.msk [vmem:[%s671_s2 + $0x8] sm:$0xff] %vm329_vm4, %v328_v32 }
 0x1b3 PF: > { %s12_s15 = sadd.s32 1, %s530_s15   ;;  %s672_s9 = smov %s510_s10 }
 0x1b4   : > { %p9_p13 = scmp.ge.s32.totalorder %s12_s15, 6   ;;  %s673_s10 = smov %s601_s22 }
 0x1b5   : > { %s674_s11 = smov %s522_s13  ;;  %s675_s12 = smov %s526_s14 }
 0x1b6   : > { %s676_s13 = smov %s679_s16  ;;  %s677_s14 = smov %s683_s17 }
 0x1b7   :  { %11 = sbr.rel (!%p9_p13) target bundleno = 4 (0x4), region = 104 }

</bundles_post_ra>
